<compile_context>
chip_gen: v7x
topology: tpu7x:2x2x1
jax: 0.10.0
libtpu: 0.0.40
codegen_flags: <defaults>
</compile_context>

<pallas_src>
import functools

import jax
import jax.numpy as jnp
from jax.experimental import pallas as pl
from jax.experimental.pallas import tpu as pltpu


_NEG_PAD = -1e9  # lane/row pad value; exp((pad - row_max) * scale) underflows to 0


def _prompt_kernel(x_ref, o_ref, *, scale):
    """out = softmax(x * scale, axis=-1) * x   (rows on sublanes, L on lanes)."""
    x = x_ref[...].astype(jnp.float32)
    if scale > 0.0:
        # softmax(x*s) == exp((x - max(x)) * s) / sum(...)  for s > 0.
        # Folding s into the exponent drops the full-tile x*s temporary.
        d = x - jnp.max(x, axis=-1, keepdims=True)
        e = jnp.exp(d * scale) if scale != 1.0 else jnp.exp(d)
    else:
        xs = x * scale
        e = jnp.exp(xs - jnp.max(xs, axis=-1, keepdims=True))
    denom = jnp.sum(e, axis=-1, keepdims=True)
    inv = pl.reciprocal(denom)  # exact; operand is only [block_rows, 1]
    o_ref[...] = (e * x * inv).astype(o_ref.dtype)


def _sublane_pack(dtype):
    itemsize = jnp.dtype(dtype).itemsize
    return max(8, 32 // itemsize)  # 8 for f32, 16 for bf16, 32 for int8/fp8


def _vmem_capacity_bytes():
    try:
        return int(pltpu.get_tpu_info().vmem_capacity_bytes)
    except Exception:
        return 64 << 20  # conservative (v7x per-TensorCore); safe everywhere


def _choose_block_rows(rows, L, dtype, target_bytes, min_steps=4):
    """Largest sublane-aligned divisor of `rows` with block <= target_bytes,
    preferring >= min_steps grid steps (>= 2 per TensorCore on v7x)."""
    pack = _sublane_pack(dtype)
    itemsize = jnp.dtype(dtype).itemsize
    row_bytes = L * itemsize
    assert rows % pack == 0
    divisors = [d for d in range(pack, rows + 1, pack) if rows % d == 0]
    capped = [d for d in divisors if d * row_bytes <= target_bytes] or [pack]
    good = [d for d in capped if rows // d >= min_steps]
    return max(good) if good else max(capped)


def prompt_forward(x, smooth: bool = False, smooth_value: float = 10.0,
                   block_rows: int | None = None):
    """JAX wrapper reproducing Prompt.forward(x) for NCHW input x.

    `smooth_value` is the (frozen) learned scalar; pass the checkpointed value
    if it differs from the 10.0 init. It is baked in at trace time.
    """
    b, c, h, w = x.shape
    L = h * w
    rows = b * c
    dtype = x.dtype
    itemsize = jnp.dtype(dtype).itemsize
    pack = _sublane_pack(dtype)

    x2 = x.reshape(rows, L)

    # Pad rows to the sublane pack and lanes to a multiple of 128 so every
    # block is lane-dense and the tiled, pipelined path is always used.
    rows_p = ((rows + pack - 1) // pack) * pack
    L_p = ((L + 127) // 128) * 128
    padded = (rows_p != rows) or (L_p != L)
    if padded:
        x2 = jnp.pad(x2, ((0, rows_p - rows), (0, L_p - L)),
                     constant_values=_NEG_PAD)

    # Size blocks and the scoped-VMEM limit against the chip's VMEM capacity.
    vmem_cap = _vmem_capacity_bytes()
    if vmem_cap >= (96 << 20):        # 128 MiB VMEM chips (v5e / v6e)
        target_bytes = 8 << 20
        vmem_limit_cap = 96 << 20
    else:                             # 64 MiB per-TC chips (v7x)
        target_bytes = 4 << 20
        vmem_limit_cap = 48 << 20

    if block_rows is None:
        block_rows = _choose_block_rows(rows_p, L_p, dtype, target_bytes)
    assert rows_p % block_rows == 0, "block_rows must divide padded b*c"

    # Deterministic scale: 10.0 (param init) when smoothing, identity otherwise.
    scale = float(smooth_value) if smooth else 1.0
    kernel = functools.partial(_prompt_kernel, scale=scale)

    block_bytes = block_rows * L_p * itemsize
    # 2x in + 2x out double buffers at the I/O dtype + ~3 full-tile f32 temps + slack.
    vmem_needed = 4 * block_bytes + 3 * block_rows * L_p * 4 + (2 << 20)
    vmem_limit = max(32 << 20, min(vmem_limit_cap, vmem_needed))

    cost = pl.CostEstimate(
        flops=5 * rows_p * L_p,
        transcendentals=rows_p * L_p,
        bytes_accessed=2 * rows_p * L_p * itemsize,
    )

    out2 = pl.pallas_call(
        kernel,
        out_shape=jax.ShapeDtypeStruct((rows_p, L_p), dtype),
        grid=(rows_p // block_rows,),
        in_specs=[pl.BlockSpec((block_rows, L_p), lambda i: (i, 0))],
        out_specs=pl.BlockSpec((block_rows, L_p), lambda i: (i, 0)),
        input_output_aliases={0: 0},   # block i fully read before written
        compiler_params=pltpu.CompilerParams(
            dimension_semantics=("parallel",),
            vmem_limit_bytes=int(vmem_limit),
        ),
        cost_estimate=cost,
    )(x2)

    if padded:
        out2 = out2[:rows, :L]
    return out2.reshape(b, c, h, w)


def prompt_reference(x, smooth: bool = False, smooth_value: float = 10.0):
    """Pure-JAX reference mirroring the PyTorch forward."""
    b, c, h, w = x.shape
    xf = x.reshape(b, c, h * w).astype(jnp.float32)
    scale = smooth_value if smooth else 1.0
    mask = jax.nn.softmax(xf * scale, axis=-1)
    return (mask * xf).astype(x.dtype).reshape(b, c, h, w)


if __name__ == "__main__":
    ok = True

    def check(x, smooth, atol, rtol):
        out = jax.block_until_ready(prompt_forward(x, smooth=smooth))
        ref = prompt_reference(x, smooth=smooth)
        return bool(jnp.allclose(out.astype(jnp.float32),
                                 ref.astype(jnp.float32),
                                 atol=atol, rtol=rtol))

    # Small shape consistent with the module: rows = b*c = 8, L = h*w = 256.
    x = jax.random.normal(jax.random.PRNGKey(0), (2, 4, 16, 16), jnp.float32)
    for smooth in (False, True):
        ok &= check(x, smooth, 1e-5, 1e-4)

    # Larger f32 case exercising the multi-step row tiling.
    x2 = jax.random.normal(jax.random.PRNGKey(1), (2, 64, 16, 16), jnp.float32)
    ok &= check(x2, True, 1e-5, 1e-4)

    # Non-aligned rows (b*c = 6) and lanes (h*w = 324 != k*128): padding path.
    x3 = jax.random.normal(jax.random.PRNGKey(2), (2, 3, 18, 18), jnp.float32)
    ok &= check(x3, True, 1e-5, 1e-4)

    # bf16 HBM I/O (f32 compute inside the kernel), looser tolerance.
    x4 = jax.random.normal(jax.random.PRNGKey(3), (2, 16, 16, 16), jnp.bfloat16)
    ok &= check(x4, False, 2e-2, 2e-2)

    if ok:
        print("KERNEL_OK")
</pallas_src>

<mosaic_0001>
module attributes {stable_mosaic.version = 11 : i64} {
  func.func @_prompt_kernel(%arg0: i32, %arg1: memref<8x256xf32, #tpu.memory_space<vmem>>, %arg2: memref<8x256xf32, #tpu.memory_space<vmem>>) attributes {dimension_semantics = [#tpu.dimension_semantics<parallel>], iteration_bounds = array<i64: 1>, scalar_prefetch = 0 : i64, scratch_operands = 0 : i64, tpu.core_type = #tpu.core_type<tc>, window_params = [{transform_indices = @transform_0, window_bounds = array<i64: 8, 256>}, {transform_indices = @transform_1, window_bounds = array<i64: 8, 256>}]} {
    %c0 = arith.constant 0 : index
    %c0_0 = arith.constant 0 : index
    %0 = vector.load %arg1[%c0, %c0_0] : memref<8x256xf32, #tpu.memory_space<vmem>>, vector<8x256xf32>
    %cst = arith.constant dense<0xFF800000> : vector<8xf32>
    %1 = vector.multi_reduction <maximumf>, %0, %cst [1] : vector<8x256xf32> to vector<8xf32>
    %2 = vector.shape_cast %1 : vector<8xf32> to vector<8x1xf32>
    %3 = vector.broadcast %2 : vector<8x1xf32> to vector<8x256xf32>
    %4 = arith.subf %0, %3 : vector<8x256xf32>
    %5 = math.exp %4 : vector<8x256xf32>
    %cst_1 = arith.constant dense<0.000000e+00> : vector<8xf32>
    %6 = vector.multi_reduction <add>, %5, %cst_1 [1] : vector<8x256xf32> to vector<8xf32>
    %7 = vector.shape_cast %6 : vector<8xf32> to vector<8x1xf32>
    %8 = tpu.reciprocal %7 : vector<8x1xf32> -> vector<8x1xf32>
    %9 = arith.mulf %5, %0 : vector<8x256xf32>
    %10 = vector.broadcast %8 : vector<8x1xf32> to vector<8x256xf32>
    %11 = arith.mulf %9, %10 : vector<8x256xf32>
    %c0_2 = arith.constant 0 : index
    %c0_3 = arith.constant 0 : index
    %12 = vector.load %arg2[%c0_2, %c0_3] : memref<8x256xf32, #tpu.memory_space<vmem>>, vector<8x256xf32>
    tpu.vector_store %arg2[%c0_2, %c0_3], %11 {strides = array<i32>} : memref<8x256xf32, #tpu.memory_space<vmem>>, vector<8x256xf32>,
    return
  }
  func.func @transform_0(%arg0: i32) -> (i32, i32) {
    %c0_i32 = arith.constant 0 : i32
    %c0_i32_0 = arith.constant 0 : i32
    return %arg0, %c0_i32 : i32, i32
  }
  func.func @transform_1(%arg0: i32) -> (i32, i32) {
    %c0_i32 = arith.constant 0 : i32
    %c0_i32_0 = arith.constant 0 : i32
    return %arg0, %c0_i32 : i32, i32
  }
}

</mosaic_0001>

<bundles_post_ra>
// kernel: tpu_custom_call.1
= control target key start
LH: loop header
LB: loop body
LE: loop exit
PB: predicated region body
PF: predicated region fallthrough
CT: control target
= control target key end

     0   :  { %6 = vsyncpa [#allocation3], 0  ;;  %s149_s0 = inlined_call_operand.hbm [shape: f32[8,256], index: 0, kind: input, shape index: {}, may-alias: {0,1}]   ;;  %s150_s1 = inlined_call_operand.hbm [shape: f32[8,256], index: 1, kind: output, shape index: {}, may-alias: {0,1}]  }
   0x1   :  { %7 = vsyncpa [#allocation4], 0  ;;  %s113_s6 = smov [#allocation2]   ;;  %s65_s10 = scalar_lea.hbm %s149_s0, 256 }
   0x2   :  { %s14_s7 = sshll.u32 %s113_s6, 4  ;;  %p66_p0 = scmp.ne.s32.totalorder %s149_s0, %s65_s10  ;;  %s15_s7 = int_to_ptr.vmem [resolvable:$true] %s14_s7 }
   0x3   :  { %p69_p1 = scmp.lt.u32.totalorder %s65_s10, %s149_s0 }
   0x5   :  { %p71_p2 = pnand %p69_p1, %p66_p0 }
   0x7   :  { %74 = shalt.err (!%p71_p2)
}
   0x8   :  { %s75_s15 = scalar_lea.vmem %s15_s7, 256  ;;  %p80_p4 = scmp.lt.s32.totalorder %s15_s7, %s15_s7 }
   0x9   :  { %p76_p3 = scmp.ne.s32.totalorder %s15_s7, %s75_s15  ;;  %p81_p5 = scmp.lt.s32.totalorder %s75_s15, %s75_s15 }
   0xb   :  { %p82_p6 = por %p81_p5, %p80_p4 }
   0xd   :  { %p83_p7 = pnand %p82_p6, %p76_p3 }
   0xf   :  { %86 = shalt.err (!%p83_p7)
}
  0x10   :  { %17 = dma.hbm_to_vmem [thread:$0]  %s149_s0, 256, %s15_s7, [#allocation3]  }
  0x11   :  { %109 = dma.done.wait [#allocation3], 256  }
  0x12   :  { %110 = vsyncadd [#allocation3], 4294967040  ;;  %v21_v0 = vld [vmem:[#allocation2] sm:$0xff]  ;;  %v22_v1 = vld [vmem:[#allocation2 + $0x8] sm:$0xff]  ;;  %s114_s0 = smov [#allocation5]  }
  0x13   :  { %v23_v2 = vmax.f32 %v21_v0, %v22_v1  ;;  %s48_s18 = sshll.u32 %s114_s0, 4  ;;  %s49_s18 = int_to_ptr.vmem [resolvable:$true] %s48_s18 }
  0x14   :  { %s87_s19 = scalar_lea.vmem %s49_s18, 256  ;;  %p92_p9 = scmp.lt.s32.totalorder %s49_s18, %s49_s18 }
  0x15   :  { %24 = vmax.xlane.f32.xlu0 %v23_v2  ;;  %p88_p8 = scmp.ne.s32.totalorder %s49_s18, %s87_s19  ;;  %p93_p10 = scmp.lt.s32.totalorder %s87_s19, %s87_s19 }
  0x17   :  { %p94_p11 = por %p93_p10, %p92_p9 }
  0x19   :  { %p95_p12 = pnand %p94_p11, %p88_p8 }
  0xa2   :  { %v25_v3 = vpop.xlane.xlu0 %24 }
  0xa3   :  { %v26_v4 = vsub.f32 %v21_v0, %v25_v3  ;;  %v27_v5 = vsub.f32 %v22_v1, %v25_v3 }
  0xa5   :  { %v28_v6 = vmul.f32 1.442695, %v26_v4  ;;  %v30_v7 = vmul.f32 1.442695, %v27_v5 }
  0xa7   :  { %59 = vpow2.f32 %v28_v6 }
  0xa8   :  { %61 = vpow2.f32 %v30_v7 }
  0xb1   :  { %v60_v8 = vpop.eup %59 }
  0xb2   :  { %v62_v9 = vpop.eup %61  ;;  %v36_v12 = vmul.f32 %v60_v8, %v21_v0 }
  0xb3   :  { %v32_v10 = vadd.f32 %v62_v9, %v60_v8  ;;  %v37_v13 = vmul.f32 %v62_v9, %v22_v1 }
  0xb5   :  { %33 = vadd.xlane.f32.xlu0 %v32_v10 }
 0x142   :  { %v34_v11 = vpop.xlane.xlu0 %33 }
 0x143   :  { %63 = vrcp.f32 %v34_v11 }
 0x14d   :  { %v64_v14 = vpop.eup %63 }
 0x14e   :  { %v38_v15 = vmul.f32 %v64_v14, %v36_v12  ;;  %v39_v16 = vmul.f32 %v64_v14, %v37_v13 }
 0x150   :  { %40 = vst [vmem:[#allocation5] sm:$0xff] %v38_v15  ;;  %41 = vst [vmem:[#allocation5 + $0x8] sm:$0xff] %v39_v16 }
 0x151   :  { %98 = shalt.err (!%p95_p12)
}
 0x152   :  { %s99_s22 = scalar_lea.hbm %s150_s1, 256 }
 0x153   :  { %p100_p13 = scmp.ne.s32.totalorder %s150_s1, %s99_s22  ;;  %p103_p0 = scmp.lt.u32.totalorder %s99_s22, %s150_s1 }
 0x155   :  { %p105_p1 = pnand %p103_p0, %p100_p13 }
 0x157   :  { %108 = shalt.err (!%p105_p1)
}
 0x158   :  { %51 = dma.vmem_to_hbm [thread:$0]  %s49_s18, 256, %s150_s1, [#allocation4]  }
 0x159   :  { %111 = dma.done.wait [#allocation4], 256  }
 0x15a   :  { %112 = vsyncadd [#allocation4], 4294967040 }
 0x15b   :  { %55 = vsyncpa [#allocation3], 1 }
 0x15c   :  { %56 = vsyncpa [#allocation4], 1 }

</bundles_post_ra>
